<compile_context>
chip_gen: v7x
topology: tpu7x:2x2x1
jax: 0.10.0
libtpu: 0.0.40
codegen_flags: <defaults>
</compile_context>

<pallas_src>
import math

import jax
import jax.numpy as jnp
from jax import lax
from jax.experimental import pallas as pl
from jax.experimental.pallas import tpu as pltpu


_VMEM_LIMIT = 48 * 1024 * 1024   # conservative cross-generation budget (v7x: 64 MiB phys)


# ----------------------------- small helpers ---------------------------------


def _round_up(x, m):
    return (x + m - 1) // m * m


def _sigmoid(x):
    return 1.0 / (1.0 + jnp.exp(-x))


def _silu(x):
    return x * _sigmoid(x)


def _softplus(x):
    return jnp.maximum(x, 0.0) + jnp.log(1.0 + jnp.exp(-jnp.abs(x)))


def _channel_tile(d_inner, target=512):
    """Largest 128-multiple tile <= target dividing d_inner (fallback: full width)."""
    for td in (target, 256, 128):
        if d_inner % td == 0:
            return td
    return d_inner      # demo-scale fallback (d_inner < 128)


def _chunk_len(L, target=16):
    for tc in (target, 8, 4, 2, 1):
        if L % tc == 0:
            return tc
    return 1


# ----------------------------- tiled bf16 matmul kernel ----------------------


def _matmul_kernel(a_ref, b_ref, o_ref, acc_ref):
    @pl.when(pl.program_id(2) == 0)
    def _():
        acc_ref[...] = jnp.zeros_like(acc_ref)

    acc_ref[...] += jnp.dot(a_ref[...], b_ref[...],
                            preferred_element_type=jnp.float32)

    @pl.when(pl.program_id(2) == pl.num_programs(2) - 1)
    def _():
        o_ref[...] = acc_ref[...].astype(o_ref.dtype)


def matmul_bf16(a, b, *, out_dtype=jnp.float32, tn=1024, tk=1024):
    """(M, K) @ (K, N): bf16 MXU operands (cast in the wrapper), f32 accumulation.

    tm is set to the full folded token dimension M (<= 2048) so each weight tile is
    streamed from HBM exactly once per call (the dominant byte stream at production
    d_model=12288/16384).
    """
    M, K = a.shape
    Kb, N = b.shape
    assert K == Kb
    a = a.astype(jnp.bfloat16)
    b = b.astype(jnp.bfloat16)

    tm = min(_round_up(M, 8), 2048)
    tn = min(tn, N)
    tk = min(tk, K)
    grid = (pl.cdiv(M, tm), pl.cdiv(N, tn), pl.cdiv(K, tk))
    gi, gj, gk = grid

    out_bytes = M * N * jnp.dtype(out_dtype).itemsize
    cost = pl.CostEstimate(
        flops=int(2 * M * N * K),
        transcendentals=0,
        # A is re-fetched once per j tile, B once per i tile.
        bytes_accessed=int(a.size * 2 * gj + b.size * 2 * gi + out_bytes))

    return pl.pallas_call(
        _matmul_kernel,
        out_shape=jax.ShapeDtypeStruct((M, N), out_dtype),
        grid=grid,
        in_specs=[pl.BlockSpec((tm, tk), lambda i, j, k: (i, k)),
                  pl.BlockSpec((tk, tn), lambda i, j, k: (k, j))],
        out_specs=pl.BlockSpec((tm, tn), lambda i, j, k: (i, j)),
        scratch_shapes=[pltpu.VMEM((tm, tn), jnp.float32)],
        compiler_params=pltpu.CompilerParams(
            dimension_semantics=("parallel", "parallel", "arbitrary"),
            vmem_limit_bytes=_VMEM_LIMIT),
        cost_estimate=cost,
    )(a, b)


# ----------------------------- causal depthwise conv + SiLU ------------------


def make_conv_silu_kernel(d_conv):
    def kernel(x_ref, cw_ref, cb_ref, o_ref):
        xi = x_ref[...].astype(jnp.float32)                    # (L, td)
        cw = cw_ref[...]                                       # (d_conv, td)
        L = xi.shape[0]
        row = lax.broadcasted_iota(jnp.int32, (L, 1), 0)
        acc = xi * cw[d_conv - 1:d_conv, :]                    # s = 0 tap
        for s in range(1, d_conv):                             # static, tiny
            tap = pltpu.roll(xi, shift=s, axis=0)              # tap[t] = xi[t-s] (mod L)
            tap = jnp.where(row >= s, tap, 0.0)                # zero the wrap-around
            acc = acc + tap * cw[d_conv - 1 - s:d_conv - s, :]
        o_ref[...] = _silu(acc + cb_ref[...]).astype(o_ref.dtype)

    return kernel


def run_conv_silu(x, cw, cb, *, d_conv):
    """x: (B, L, d_inner) bf16 -> SiLU(causal depthwise conv(x) + b): (B, L, d_inner) bf16."""
    B, L, d_inner = x.shape
    td = _channel_tile(d_inner)
    nc = d_inner // td
    return pl.pallas_call(
        make_conv_silu_kernel(d_conv),
        out_shape=jax.ShapeDtypeStruct((B, L, d_inner), jnp.bfloat16),
        grid=(B, nc),
        in_specs=[pl.BlockSpec((None, L, td), lambda b, c: (b, 0, c)),
                  pl.BlockSpec((d_conv, td), lambda b, c: (0, c)),
                  pl.BlockSpec((1, td), lambda b, c: (0, c))],
        out_specs=pl.BlockSpec((None, L, td), lambda b, c: (b, 0, c)),
        compiler_params=pltpu.CompilerParams(
            dimension_semantics=("parallel", "parallel"),
            vmem_limit_bytes=_VMEM_LIMIT),
    )(x, cw, cb)


# ----------------------------- chunked selective scan + gate -----------------


def make_scan_gate_kernel(L, Tc):
    """Per (batch, d_inner tile): softplus(dt) -> selective scan -> +D*xc -> SiLU gate.

    Ref shapes (batch + channel tile selected by BlockSpec):
      xc_ref   (L, td)       conv output                 bf16
      z_ref    (L, td)       gate branch                 bf16
      dtp_ref  (L, td)       dt_proj output (pre-bias)   f32
      bm_ref   (L, d_state)  B_t                         f32
      cm_ref   (L, d_state)  C_t                         f32
      at_log_ref (d_state, td)  A_log (transposed)       f32
      d_ref    (1, td)       D skip                      f32
      bdt_ref  (1, td)       dt bias                     f32
      o_ref    (L, td)       gated SSM output            bf16
      h_s      (d_state, td) VMEM scratch: state carried across chunks (f32)
    """
    n_chunks = L // Tc

    def kernel(xc_ref, z_ref, dtp_ref, bm_ref, cm_ref, at_log_ref, d_ref,
               bdt_ref, o_ref, h_s):
        AT = -jnp.exp(at_log_ref[...])                       # (d_state, td)
        D = d_ref[...]                                       # (1, td)
        bdt = bdt_ref[...]                                   # (1, td)
        h_s[...] = jnp.zeros_like(h_s)

        @pl.loop(0, n_chunks)
        def _(ci):
            base = pl.multiple_of(ci * Tc, Tc)
            dt_c = _softplus(dtp_ref[pl.ds(base, Tc), :] + bdt)            # (Tc, td)
            xc_c = xc_ref[pl.ds(base, Tc), :].astype(jnp.float32)          # (Tc, td)
            u_c = dt_c * xc_c
            Bc = bm_ref[pl.ds(base, Tc), :]                                # (Tc, d_state)
            Cc = cm_ref[pl.ds(base, Tc), :]                                # (Tc, d_state)
            BcT = Bc.T                                                     # one XLU transpose per chunk
            h = h_s[...]                                                   # (d_state, td) f32
            rows = []
            for t in range(Tc):                                            # short static unroll per chunk
                dt_t = dt_c[t:t + 1, :]                                    # (1, td)
                decay = jnp.exp(AT * dt_t)                                 # EUP
                h = decay * h + BcT[:, t:t + 1] * u_c[t:t + 1, :]          # (d_state, td)
                rows.append(jnp.dot(Cc[t:t + 1, :], h,                     # MXU matvec
                                    preferred_element_type=jnp.float32))
            h_s[...] = h
            y_c = jnp.concatenate(rows, axis=0) + D * xc_c                 # (Tc, td)
            z_c = z_ref[pl.ds(base, Tc), :].astype(jnp.float32)
            o_ref[pl.ds(base, Tc), :] = (y_c * _silu(z_c)).astype(o_ref.dtype)

    return kernel


def run_scan_gate(xc, z, dt_pre, Bm, Cm, p, *, L, d_inner, d_state):
    B = xc.shape[0]
    td = _channel_tile(d_inner)
    nc = d_inner // td
    Tc = _chunk_len(L)
    kernel = make_scan_gate_kernel(L, Tc)

    cost = pl.CostEstimate(
        flops=int(B * L * d_inner * (6 * d_state + 12)),
        transcendentals=int(B * L * d_inner * (d_state + 6)),
        bytes_accessed=int(xc.size * 2 + z.size * 2 + dt_pre.size * 4
                           + (Bm.size + Cm.size) * 4 * nc
                           + B * L * d_inner * 2))

    return pl.pallas_call(
        kernel,
        out_shape=jax.ShapeDtypeStruct((B, L, d_inner), jnp.bfloat16),
        grid=(B, nc),
        in_specs=[
            pl.BlockSpec((None, L, td), lambda b, c: (b, 0, c)),          # xc
            pl.BlockSpec((None, L, td), lambda b, c: (b, 0, c)),          # z
            pl.BlockSpec((None, L, td), lambda b, c: (b, 0, c)),          # dt_pre
            pl.BlockSpec((None, L, d_state), lambda b, c: (b, 0, 0)),     # Bm (c-invariant, small)
            pl.BlockSpec((None, L, d_state), lambda b, c: (b, 0, 0)),     # Cm
            pl.BlockSpec((d_state, td), lambda b, c: (0, c)),             # A_log^T
            pl.BlockSpec((1, td), lambda b, c: (0, c)),                   # D
            pl.BlockSpec((1, td), lambda b, c: (0, c)),                   # dt bias
        ],
        out_specs=pl.BlockSpec((None, L, td), lambda b, c: (b, 0, c)),
        scratch_shapes=[pltpu.VMEM((d_state, td), jnp.float32)],
        compiler_params=pltpu.CompilerParams(
            dimension_semantics=("parallel", "parallel"),
            vmem_limit_bytes=_VMEM_LIMIT),
        cost_estimate=cost,
    )(xc, z, dt_pre, Bm, Cm, p["AT_log"], p["D"], p["b_dt"])


# ----------------------------- one full Mamba block ---------------------------


def run_mamba_block(x, p, *, d_inner, d_state, d_conv, dt_rank, d_out,
                    out_dtype=jnp.float32):
    """x: (B, L, d_in) -> (B, L, d_out)."""
    B, L, d_in = x.shape
    M = B * L
    xf = x.reshape(M, d_in)

    # in_proj: x-branch and gate z as two weight streams (bf16 LHS & outputs).
    x_in = matmul_bf16(xf, p["w_in_x"], out_dtype=jnp.bfloat16)           # (M, d_inner)
    z = matmul_bf16(xf, p["w_in_z"], out_dtype=jnp.bfloat16)              # (M, d_inner)

    # Causal depthwise conv + SiLU (per batch, tiled over d_inner), xc kept bf16.
    xc = run_conv_silu(x_in.reshape(B, L, d_inner), p["cw"], p["cb"], d_conv=d_conv)

    # x_proj (fused dt|B|C) and dt_proj through the tiled MXU path (fold B*L).
    xcf = xc.reshape(M, d_inner)
    xp = matmul_bf16(xcf, p["w_xp"], out_dtype=jnp.float32)               # (M, dt_rank+2*d_state)
    dt_low = xp[:, :dt_rank]
    Bm = xp[:, dt_rank:dt_rank + d_state]
    Cm = xp[:, dt_rank + d_state:]
    dt_pre = matmul_bf16(dt_low, p["w_dt"], out_dtype=jnp.float32)        # (M, d_inner), dt kept f32

    # Selective scan + D skip + SiLU gate (per batch, tiled over d_inner, chunked in L).
    y = run_scan_gate(xc, z.reshape(B, L, d_inner), dt_pre.reshape(B, L, d_inner),
                      Bm.reshape(B, L, d_state), Cm.reshape(B, L, d_state), p,
                      L=L, d_inner=d_inner, d_state=d_state)              # (B, L, d_inner) bf16

    # out_proj.
    out = matmul_bf16(y.reshape(M, d_inner), p["w_out"], out_dtype=out_dtype)
    return out.reshape(B, L, d_out)


# ----------------------------- parameter construction ------------------------


def init_mamba_params(key, d_in, d_model, d_state, d_conv, expand):
    """Deterministic synthetic init mirroring mamba_ssm.Mamba parameter shapes.

    PyTorch shapes -> kernel layout:
      in_proj.weight  (2*d_inner, d_in)    -> w_in_x / w_in_z  (d_in, d_inner)   bf16
      conv1d.weight   (d_inner, 1, d_conv) -> cw    (d_conv, d_inner)            f32
      conv1d.bias     (d_inner,)           -> cb    (1, d_inner)                 f32
      x_proj.weight   (dt_rank+2*d_state, d_inner)
                                           -> w_xp  (d_inner, dt_rank+2*d_state) bf16 (fused)
      dt_proj.weight  (d_inner, dt_rank)   -> w_dt  (dt_rank, d_inner)           bf16
      dt_proj.bias    (d_inner,)           -> b_dt  (1, d_inner)                 f32
      A_log           (d_inner, d_state)   -> AT_log (d_state, d_inner)          f32
      D               (d_inner,)           -> D     (1, d_inner)                 f32
      out_proj.weight (d_model, d_inner)   -> w_out (d_inner, d_model)           bf16
    """
    d_inner = expand * d_model
    dt_rank = math.ceil(d_model / 16)
    ks = jax.random.split(key, 7)

    def lin(k, fan_in, shape, dtype=jnp.float32):
        w = jax.random.normal(k, shape, jnp.float32) / jnp.sqrt(float(fan_in))
        return w.astype(dtype)

    p = dict(
        w_in_x=lin(ks[0], d_in, (d_in, d_inner), jnp.bfloat16),
        w_in_z=lin(ks[1], d_in, (d_in, d_inner), jnp.bfloat16),
        cw=lin(ks[2], d_conv, (d_conv, d_inner)),
        cb=lin(ks[3], d_conv, (1, d_inner)),
        w_xp=lin(ks[4], d_inner, (d_inner, dt_rank + 2 * d_state), jnp.bfloat16),
        w_dt=lin(ks[5], dt_rank, (dt_rank, d_inner), jnp.bfloat16),
        b_dt=jnp.full((1, d_inner), -3.0, jnp.float32),          # softplus(-3) ~ 0.05
        AT_log=jnp.log(jnp.arange(1, d_state + 1, dtype=jnp.float32))[:, None]
        * jnp.ones((1, d_inner), jnp.float32),                    # S4D-real style init
        D=jnp.ones((1, d_inner), jnp.float32),
        w_out=lin(ks[6], d_inner, (d_inner, d_model), jnp.bfloat16),
    )
    dims = dict(d_inner=d_inner, d_state=d_state, d_conv=d_conv,
                dt_rank=dt_rank, d_out=d_model)
    return p, dims


# ----------------------------- VaryMambaModel forward ------------------------


def vary_mamba_forward(condition, pe, p1, dims1, p2, dims2):
    # x = pe.repeat(B, 1, 1) + condition  (broadcast add is XLA glue; hot path is kernels)
    x = pe + condition                                          # (B, L, d_model)
    x = run_mamba_block(x, p1, **dims1, out_dtype=jnp.bfloat16)  # Mamba(d_model)
    x = run_mamba_block(x, p2, **dims2, out_dtype=jnp.float32)   # Mamba(post_d_model)
    return x


# ----------------------------- demo --------------------------------------------


if __name__ == "__main__":
    # Small shapes consistent with the module's forward (original config uses
    # d_model=12288, post_d_model=16384, d_state=128, d_conv=4, expand=2).
    B, L = 2, 8
    d_model, post_d_model = 32, 48
    d_state, d_conv, expand = 8, 4, 2

    key = jax.random.PRNGKey(0)
    k_pe, k_cond, k_m1, k_m2 = jax.random.split(key, 4)

    # positional_embedding buffer pe: (1, L, d_model); condition: (B, L, d_model)
    pe = jax.random.normal(k_pe, (1, L, d_model), jnp.float32)
    condition = jax.random.normal(k_cond, (B, L, d_model), jnp.float32)

    # mamba1: Mamba(d_model); mamba2: Mamba(post_d_model) with in_proj replaced to
    # take mamba1.out_proj.out_features (= d_model) as input dim.
    p1, dims1 = init_mamba_params(k_m1, d_in=d_model, d_model=d_model,
                                  d_state=d_state, d_conv=d_conv, expand=expand)
    p2, dims2 = init_mamba_params(k_m2, d_in=d_model, d_model=post_d_model,
                                  d_state=d_state, d_conv=d_conv, expand=expand)

    out = vary_mamba_forward(condition, pe, p1, dims1, p2, dims2)
    out = jax.block_until_ready(out)

    assert out.shape == (B, L, post_d_model), out.shape
    assert out.dtype == jnp.float32
    assert bool(jnp.all(jnp.isfinite(out)))
    print("KERNEL_OK")
</pallas_src>

<mosaic_0001>
module attributes {stable_mosaic.version = 11 : i64} {
  func.func @_matmul_kernel(%arg0: i32, %arg1: i32, %arg2: i32, %arg3: memref<16x32xbf16, #tpu.memory_space<vmem>>, %arg4: memref<32x64xbf16, #tpu.memory_space<vmem>>, %arg5: memref<16x64xbf16, #tpu.memory_space<vmem>>, %arg6: memref<16x64xf32, #tpu.memory_space<vmem>>) attributes {dimension_semantics = [#tpu.dimension_semantics<parallel>, #tpu.dimension_semantics<parallel>, #tpu.dimension_semantics<arbitrary>], iteration_bounds = array<i64: 1, 1, 1>, scalar_prefetch = 0 : i64, scratch_operands = 1 : i64, tpu.core_type = #tpu.core_type<tc>, window_params = [{transform_indices = @transform_0, window_bounds = array<i64: 16, 32>}, {transform_indices = @transform_1, window_bounds = array<i64: 32, 64>}, {transform_indices = @transform_2, window_bounds = array<i64: 16, 64>}]} {
    %c0_i32 = arith.constant 0 : i32
    %0 = arith.cmpi eq, %arg2, %c0_i32 : i32
    %1 = arith.extui %0 : i1 to i32
    %c0_i32_0 = arith.constant 0 : i32
    %2 = arith.cmpi ne, %1, %c0_i32_0 : i32
    scf.if %2 {
      %cst_10 = arith.constant 0.000000e+00 : f32
      %12 = vector.broadcast %cst_10 : f32 to vector<16x64xf32>
      %c0_11 = arith.constant 0 : index
      %c0_12 = arith.constant 0 : index
      %13 = vector.load %arg6[%c0_11, %c0_12] : memref<16x64xf32, #tpu.memory_space<vmem>>, vector<16x64xf32>
      tpu.vector_store %arg6[%c0_11, %c0_12], %12 {strides = array<i32>} : memref<16x64xf32, #tpu.memory_space<vmem>>, vector<16x64xf32>,
    } else {
    }
    %c0 = arith.constant 0 : index
    %c0_1 = arith.constant 0 : index
    %3 = vector.load %arg6[%c0, %c0_1] : memref<16x64xf32, #tpu.memory_space<vmem>>, vector<16x64xf32>
    %c0_2 = arith.constant 0 : index
    %c0_3 = arith.constant 0 : index
    %4 = vector.load %arg3[%c0_2, %c0_3] : memref<16x32xbf16, #tpu.memory_space<vmem>>, vector<16x32xbf16>
    %c0_4 = arith.constant 0 : index
    %c0_5 = arith.constant 0 : index
    %5 = vector.load %arg4[%c0_4, %c0_5] : memref<32x64xbf16, #tpu.memory_space<vmem>>, vector<32x64xbf16>
    %cst = arith.constant dense<0.000000e+00> : vector<16x64xf32>
    %6 = tpu.matmul %4, %5, %cst {dimension_numbers = #tpu.dot_dimension_numbers<[1], [0], [0], [1], [0, 0, 1, 1], [], []>} : vector<16x32xbf16>, vector<32x64xbf16>, vector<16x64xf32> -> vector<16x64xf32>
    %7 = arith.addf %3, %6 : vector<16x64xf32>
    %c0_6 = arith.constant 0 : index
    %c0_7 = arith.constant 0 : index
    %8 = vector.load %arg6[%c0_6, %c0_7] : memref<16x64xf32, #tpu.memory_space<vmem>>, vector<16x64xf32>
    tpu.vector_store %arg6[%c0_6, %c0_7], %7 {strides = array<i32>} : memref<16x64xf32, #tpu.memory_space<vmem>>, vector<16x64xf32>,
    %c0_i32_8 = arith.constant 0 : i32
    %9 = arith.cmpi eq, %arg2, %c0_i32_8 : i32
    %10 = arith.extui %9 : i1 to i32
    %c0_i32_9 = arith.constant 0 : i32
    %11 = arith.cmpi ne, %10, %c0_i32_9 : i32
    scf.if %11 {
      %c0_10 = arith.constant 0 : index
      %c0_11 = arith.constant 0 : index
      %12 = vector.load %arg6[%c0_10, %c0_11] : memref<16x64xf32, #tpu.memory_space<vmem>>, vector<16x64xf32>
      %13 = arith.truncf %12 : vector<16x64xf32> to vector<16x64xbf16>
      %c0_12 = arith.constant 0 : index
      %c0_13 = arith.constant 0 : index
      %14 = vector.load %arg5[%c0_12, %c0_13] : memref<16x64xbf16, #tpu.memory_space<vmem>>, vector<16x64xbf16>
      tpu.vector_store %arg5[%c0_12, %c0_13], %13 {strides = array<i32>} : memref<16x64xbf16, #tpu.memory_space<vmem>>, vector<16x64xbf16>,
    } else {
    }
    return
  }
  func.func @transform_0(%arg0: i32, %arg1: i32, %arg2: i32) -> (i32, i32) {
    %c0_i32 = arith.constant 0 : i32
    return %arg0, %arg2 : i32, i32
  }
  func.func @transform_1(%arg0: i32, %arg1: i32, %arg2: i32) -> (i32, i32) {
    %c0_i32 = arith.constant 0 : i32
    return %arg2, %arg1 : i32, i32
  }
  func.func @transform_2(%arg0: i32, %arg1: i32, %arg2: i32) -> (i32, i32) {
    %c0_i32 = arith.constant 0 : i32
    return %arg0, %arg1 : i32, i32
  }
}

</mosaic_0001>

<bundles_post_ra>
// kernel: tpu_custom_call.1
= control target key start
LH: loop header
LB: loop body
LE: loop exit
PB: predicated region body
PF: predicated region fallthrough
CT: control target
= control target key end

     0   :  { %7 = vsyncpa [#allocation4], 0  ;;  %s329_s0 = inlined_call_operand.hbm [shape: bf16[16,32], index: 0, kind: input, shape index: {}]   ;;  %s330_s1 = inlined_call_operand.hbm [shape: bf16[32,64], index: 1, kind: input, shape index: {}]   ;;  %s331_s2 = inlined_call_operand.hbm [shape: bf16[16,64], index: 2, kind: output, shape index: {}]  }
   0x1   :  { %8 = vsyncpa [#allocation7], 0 }
   0x2   :  { %9 = vsyncpa [#allocation5], 0  ;;  %s258_s9 = smov [#allocation3]   ;;  %s186_s13 = scalar_lea.hbm %s329_s0, 128 }
   0x3   :  { %s15_s10 = sshll.u32 %s258_s9, 4  ;;  %p187_p0 = scmp.ne.s32.totalorder %s329_s0, %s186_s13  ;;  %s16_s10 = int_to_ptr.vmem [resolvable:$true] %s15_s10 }
   0x4   :  { %p190_p1 = scmp.lt.u32.totalorder %s186_s13, %s329_s0 }
   0x6   :  { %p192_p2 = pnand %p190_p1, %p187_p0 }
   0x8   :  { %195 = shalt.err (!%p192_p2)
}
   0x9   :  { %s196_s18 = scalar_lea.vmem %s16_s10, 128  ;;  %p201_p4 = scmp.lt.s32.totalorder %s16_s10, %s16_s10 }
   0xa   :  { %p197_p3 = scmp.ne.s32.totalorder %s16_s10, %s196_s18  ;;  %p202_p5 = scmp.lt.s32.totalorder %s196_s18, %s196_s18 }
   0xc   :  { %p203_p6 = por %p202_p5, %p201_p4 }
   0xe   :  { %p204_p7 = pnand %p203_p6, %p197_p3 }
  0x10   :  { %207 = shalt.err (!%p204_p7)
}
  0x11   :  { %s259_s19 = smov 64   ;;  %s260_s20 = smov 4  }
  0x12   :  { %21 = dma.hbm_to_vmem [thread:$0]  %s329_s0, 128, %s16_s10, [#allocation4], %s259_s19, %s259_s19, %s260_s20  }
  0x13   :  { %s261_s23 = smov [#allocation6]   ;;  %s208_s27 = scalar_lea.hbm %s330_s1, 256 }
  0x14   :  { %s27_s24 = sshll.u32 %s261_s23, 4  ;;  %p209_p8 = scmp.ne.s32.totalorder %s330_s1, %s208_s27  ;;  %s28_s24 = int_to_ptr.vmem [resolvable:$true] %s27_s24 }
  0x15   :  { %p212_p9 = scmp.lt.u32.totalorder %s208_s27, %s330_s1 }
  0x17   :  { %p214_p10 = pnand %p212_p9, %p209_p8 }
  0x19   :  { %217 = shalt.err (!%p214_p10)
}
  0x1a   :  { %s218_s4 = scalar_lea.vmem %s28_s24, 256  ;;  %p223_p12 = scmp.lt.s32.totalorder %s28_s24, %s28_s24 }
  0x1b   :  { %p219_p11 = scmp.ne.s32.totalorder %s28_s24, %s218_s4  ;;  %p224_p13 = scmp.lt.s32.totalorder %s218_s4, %s218_s4 }
  0x1d   :  { %p225_p0 = por %p224_p13, %p223_p12 }
  0x1f   :  { %p226_p1 = pnand %p225_p0, %p219_p11 }
  0x21   :  { %229 = shalt.err (!%p226_p1)
}
  0x22   :  { %33 = dma.hbm_to_vmem [thread:$0]  %s330_s1, 256, %s28_s24, [#allocation7], %s259_s19, %s259_s19, %s260_s20  }
  0x23   :  { %252 = dma.done.wait [#allocation4], 128  }
  0x24   :  { %253 = vsyncadd [#allocation4], 4294967168 }
  0x25   :  { %254 = dma.done.wait [#allocation7], 256  }
  0x26   :  { %255 = vsyncadd [#allocation7], 4294967040  ;;  %vm45_vm0 = vcmask 523264   ;;  %v262_v0 = vmov 0.0   ;;  %vm263_vm1 = vmmov 0   ;;  %v183_v1 = vld [vmem:[#allocation6] sm:$0xff]  }
  0x27   :  { %46 = vst.msk [vmem:[#allocation2] sm:$0xff] %vm45_vm0, %v262_v0  ;;  %47 = vst.msk [vmem:[#allocation2 + $0x8] sm:$0xff] %vm45_vm0, %v262_v0  ;;  %168 = vmatprep.subr.bf16.mxu0 %v262_v0  ;;  %172 = vmatprep.mubr.msk.bf16.mxu0 %vm263_vm1, %v262_v0  ;;  %v184_v2 = vld [vmem:[#allocation6 + $0x8] sm:$0xff]   ;;  %v185_v3 = vld [vmem:[#allocation3] sm:$0xff]   ;;  %vm73_vm2 = vcmask 261120   ;;  %vm136_vm3 = vcmask 519168  }
  0x28   :  { %169 = vmatpush3.bf16.msra.mxu0 %v183_v1  ;;  %s264_s1 = smov [#allocation8]  }
  0x29   :  { %170 = vmatprep.subr.bf16.mxu0 %v262_v0  ;;  %s144_s6 = sshll.u32 %s264_s1, 4  ;;  %s145_s6 = int_to_ptr.vmem [resolvable:$true] %s144_s6 }
  0x2a   :  { %s230_s7 = scalar_lea.vmem %s145_s6, 128  ;;  %p235_p3 = scmp.lt.s32.totalorder %s145_s6, %s145_s6 }
  0x2b   :  { %p231_p2 = scmp.ne.s32.totalorder %s145_s6, %s230_s7  ;;  %p236_p4 = scmp.lt.s32.totalorder %s230_s7, %s230_s7 }
  0x2c   :  { %171 = vmatpush3.bf16.msra.mxu0 %v184_v2 }
  0x2d   :  { %p237_p5 = por %p236_p4, %p235_p3 }
  0x2e   :  { %v48_v4 = vld [vmem:[#allocation2] sm:$0xff]  ;;  %v49_v6 = vld [vmem:[#allocation2 + $0x8] sm:$0xff] }
  0x2f   :  { %173 = vmatmul.mubr.msk.bf16.vlgmr.msra.gmra.mrb[0].mxu0 %vm73_vm2, %v185_v3  ;;  %p238_p6 = pnand %p237_p5, %p231_p2 }
 0x102   :  { %v111_v5 = vpop.f32.mrb[0].mxu0 }
 0x103   :  { %v118_v7 = vadd.f32 %v111_v5, %v48_v4  ;;  %v174_v8 = vpop.f32.mrb[1].mxu0 }
 0x104   :  { %v114_v9 = vpop.f32.mrb[2].mxu0 }
 0x105   :  { %121 = vst.msk [vmem:[#allocation2] sm:$0xff] %vm45_vm0, %v118_v7  ;;  %v119_v10 = vadd.f32 %v114_v9, %v49_v6  ;;  %v175_v11 = vpop.f32.mrb[3].mxu0 }
 0x107   :  { %122 = vst.msk [vmem:[#allocation2 + $0x8] sm:$0xff] %vm45_vm0, %v119_v10 }
 0x10c   :  { %v126_v12 = vld [vmem:[#allocation2] sm:$0xff] }
 0x10d   :  { %v163_v13 = vpack.c.bf16 %v126_v12, %v126_v12 }
 0x10e   :  { %v127_v14 = vld [vmem:[#allocation2 + $0x8] sm:$0xff] }
 0x10f   :  { %v164_v15 = vpack.c.bf16 %v127_v14, %v127_v14  ;;  %137 = vst.msk [vmem:[#allocation8] sm:$0xf] %vm136_vm3, %v163_v13 }
 0x111   :  { %138 = vst.msk [vmem:[#allocation8 + $0x4] sm:$0xf] %vm136_vm3, %v164_v15 }
 0x112   :  { %241 = shalt.err (!%p238_p6)
}
 0x113   :  { %s242_s10 = scalar_lea.hbm %s331_s2, 128 }
 0x114   :  { %p243_p7 = scmp.ne.s32.totalorder %s331_s2, %s242_s10  ;;  %p246_p8 = scmp.lt.u32.totalorder %s242_s10, %s331_s2 }
 0x116   :  { %p248_p9 = pnand %p246_p8, %p243_p7 }
 0x118   :  { %251 = shalt.err (!%p248_p9)
}
 0x119   :  { %150 = dma.vmem_to_hbm [thread:$0]  %s145_s6, 128, %s331_s2, [#allocation5], %s259_s19, %s259_s19, %s260_s20  }
 0x11a   :  { %256 = dma.done.wait [#allocation5], 128  }
 0x11b   :  { %257 = vsyncadd [#allocation5], 4294967168 }
 0x11c   :  { %154 = vsyncpa [#allocation4], 1 }
 0x11d   :  { %155 = vsyncpa [#allocation7], 1 }
 0x11e   :  { %156 = vsyncpa [#allocation5], 1 }

</bundles_post_ra>
